<compile_context>
chip_gen: v5e
topology: v5e:2x2
jax: 0.10.0
libtpu: 0.0.40
codegen_flags: <defaults>
</compile_context>

<pallas_src>
import jax
import jax.numpy as jnp
from jax.experimental import pallas as pl
from jax.experimental.pallas import tpu as pltpu


def simple_classifier_kernel(x_ref, w1_ref, b1_ref, w2_ref, b2_ref, out_ref):
    """Fused MLP block: out = relu(x @ W1 + b1) @ W2 + b2 for one row block."""
    x = x_ref[...]                                                    # (Bt, in_dim)
    h = jnp.dot(x, w1_ref[...], preferred_element_type=jnp.float32)   # MXU
    h = h + b1_ref[...]
    h = jnp.maximum(h, 0.0)                                           # ReLU (VPU)
    # Dropout is identity at inference time.
    y = jnp.dot(h, w2_ref[...], preferred_element_type=jnp.float32)   # MXU
    y = y + b2_ref[...]
    out_ref[...] = y.astype(out_ref.dtype)


def simple_classifier(x, params, *, block_rows=128):
    """Pallas forward for SimpleClassifier.

    params:
      v1 (in_dim, hid_dim), g1 scalar, b1 (hid_dim,)
      v2 (hid_dim, out_dim), g2 scalar, b2 (out_dim,)
    Effective weights (weight_norm with dim=None): w = g * v / ||v||_F.
    """
    B, in_dim = x.shape
    hid_dim = params["v1"].shape[1]
    out_dim = params["v2"].shape[1]

    # Fold the weight_norm scalar scale into the weights once (wrapper-side,
    # parameter transform — not per-example work).
    w1 = params["g1"] * params["v1"] / jnp.sqrt(jnp.sum(params["v1"] ** 2))
    w2 = params["g2"] * params["v2"] / jnp.sqrt(jnp.sum(params["v2"] ** 2))
    b1 = params["b1"].reshape(1, hid_dim)
    b2 = params["b2"].reshape(1, out_dim)

    # Row-block size: multiple of 8 (sublane rule), aim for full MXU row fill.
    bt = min(block_rows, max(8, B))
    bt = max(8, (bt // 8) * 8)
    n_blocks = pl.cdiv(B, bt)
    b_pad = n_blocks * bt
    if b_pad != B:
        x = jnp.pad(x, ((0, b_pad - B), (0, 0)))

    x_spec = pl.BlockSpec((bt, in_dim), lambda i: (i, 0))
    w1_spec = pl.BlockSpec((in_dim, hid_dim), lambda i: (0, 0))
    b1_spec = pl.BlockSpec((1, hid_dim), lambda i: (0, 0))
    w2_spec = pl.BlockSpec((hid_dim, out_dim), lambda i: (0, 0))
    b2_spec = pl.BlockSpec((1, out_dim), lambda i: (0, 0))
    o_spec = pl.BlockSpec((bt, out_dim), lambda i: (i, 0))

    out = pl.pallas_call(
        simple_classifier_kernel,
        out_shape=jax.ShapeDtypeStruct((b_pad, out_dim), jnp.float32),
        grid_spec=pltpu.PrefetchScalarGridSpec(
            num_scalar_prefetch=0,
            grid=(n_blocks,),
            in_specs=[x_spec, w1_spec, b1_spec, w2_spec, b2_spec],
            out_specs=o_spec,
        ),
        compiler_params=pltpu.CompilerParams(
            dimension_semantics=("parallel",)),
    )(x, w1, b1, w2, b2)

    return out[:B]


def reference_jax(x, params):
    """Pure-JAX reference mirroring the PyTorch forward (dropout = identity)."""
    w1 = params["g1"] * params["v1"] / jnp.sqrt(jnp.sum(params["v1"] ** 2))
    w2 = params["g2"] * params["v2"] / jnp.sqrt(jnp.sum(params["v2"] ** 2))
    h = jnp.maximum(x @ w1 + params["b1"], 0.0)
    return h @ w2 + params["b2"]


if __name__ == "__main__":
    # Small, lane-aligned shapes consistent with the module's forward:
    # x: (batch, in_dim) -> logits: (batch, out_dim)
    B, IN, HID, OUT = 256, 128, 256, 128

    key = jax.random.PRNGKey(0)
    ks = jax.random.split(key, 6)

    params = {
        "v1": 0.05 * jax.random.normal(ks[0], (IN, HID), jnp.float32),
        "g1": jnp.float32(3.0),
        "b1": 0.05 * jax.random.normal(ks[1], (HID,), jnp.float32),
        "v2": 0.05 * jax.random.normal(ks[2], (HID, OUT), jnp.float32),
        "g2": jnp.float32(2.0),
        "b2": 0.05 * jax.random.normal(ks[3], (OUT,), jnp.float32),
    }
    x = jax.random.normal(ks[4], (B, IN), jnp.float32)

    out = simple_classifier(x, params, block_rows=128)
    out = jax.block_until_ready(out)

    ref = reference_jax(x, params)
    assert out.shape == (B, OUT)
    assert jnp.allclose(out, ref, atol=1e-4, rtol=1e-4), "mismatch vs reference"

    print("KERNEL_OK")
</pallas_src>

<mosaic_0001>
module attributes {stable_mosaic.version = 11 : i64} {
  func.func @simple_classifier_kernel(%arg0: i32, %arg1: memref<128x128xf32, #tpu.memory_space<vmem>>, %arg2: memref<128x256xf32, #tpu.memory_space<vmem>>, %arg3: memref<1x256xf32, #tpu.memory_space<vmem>>, %arg4: memref<256x128xf32, #tpu.memory_space<vmem>>, %arg5: memref<1x128xf32, #tpu.memory_space<vmem>>, %arg6: memref<128x128xf32, #tpu.memory_space<vmem>>) attributes {dimension_semantics = [#tpu.dimension_semantics<parallel>], iteration_bounds = array<i64: 2>, scalar_prefetch = 0 : i64, scratch_operands = 0 : i64, tpu.core_type = #tpu.core_type<tc>, window_params = [{transform_indices = @transform_0, window_bounds = array<i64: 128, 128>}, {pipeline_mode = #tpu.pipeline_mode<synchronous>, transform_indices = @transform_1, window_bounds = array<i64: 128, 256>}, {pipeline_mode = #tpu.pipeline_mode<synchronous>, transform_indices = @transform_2, window_bounds = array<i64: 1, 256>}, {pipeline_mode = #tpu.pipeline_mode<synchronous>, transform_indices = @transform_3, window_bounds = array<i64: 256, 128>}, {pipeline_mode = #tpu.pipeline_mode<synchronous>, transform_indices = @transform_4, window_bounds = array<i64: 1, 128>}, {transform_indices = @transform_5, window_bounds = array<i64: 128, 128>}]} {
    %c0 = arith.constant 0 : index
    %c0_0 = arith.constant 0 : index
    %0 = vector.load %arg1[%c0, %c0_0] : memref<128x128xf32, #tpu.memory_space<vmem>>, vector<128x128xf32>
    %c0_1 = arith.constant 0 : index
    %c0_2 = arith.constant 0 : index
    %1 = vector.load %arg2[%c0_1, %c0_2] : memref<128x256xf32, #tpu.memory_space<vmem>>, vector<128x256xf32>
    %cst = arith.constant dense<0.000000e+00> : vector<128x256xf32>
    %2 = tpu.matmul %0, %1, %cst {dimension_numbers = #tpu.dot_dimension_numbers<[1], [0], [0], [1], [0, 0, 1, 1], [], []>} : vector<128x128xf32>, vector<128x256xf32>, vector<128x256xf32> -> vector<128x256xf32>
    %c0_3 = arith.constant 0 : index
    %c0_4 = arith.constant 0 : index
    %3 = vector.load %arg3[%c0_3, %c0_4] : memref<1x256xf32, #tpu.memory_space<vmem>>, vector<1x256xf32>
    %4 = vector.broadcast %3 : vector<1x256xf32> to vector<128x256xf32>
    %5 = arith.addf %2, %4 : vector<128x256xf32>
    %cst_5 = arith.constant 0.000000e+00 : f32
    %6 = vector.broadcast %cst_5 : f32 to vector<128x256xf32>
    %7 = arith.maximumf %5, %6 : vector<128x256xf32>
    %c0_6 = arith.constant 0 : index
    %c0_7 = arith.constant 0 : index
    %8 = vector.load %arg4[%c0_6, %c0_7] : memref<256x128xf32, #tpu.memory_space<vmem>>, vector<256x128xf32>
    %cst_8 = arith.constant dense<0.000000e+00> : vector<128x128xf32>
    %9 = tpu.matmul %7, %8, %cst_8 {dimension_numbers = #tpu.dot_dimension_numbers<[1], [0], [0], [1], [0, 0, 1, 1], [], []>} : vector<128x256xf32>, vector<256x128xf32>, vector<128x128xf32> -> vector<128x128xf32>
    %c0_9 = arith.constant 0 : index
    %c0_10 = arith.constant 0 : index
    %10 = vector.load %arg5[%c0_9, %c0_10] : memref<1x128xf32, #tpu.memory_space<vmem>>, vector<1x128xf32>
    %11 = vector.broadcast %10 : vector<1x128xf32> to vector<128x128xf32>
    %12 = arith.addf %9, %11 : vector<128x128xf32>
    %c0_11 = arith.constant 0 : index
    %c0_12 = arith.constant 0 : index
    %13 = vector.load %arg6[%c0_11, %c0_12] : memref<128x128xf32, #tpu.memory_space<vmem>>, vector<128x128xf32>
    tpu.vector_store %arg6[%c0_11, %c0_12], %12 {strides = array<i32>} : memref<128x128xf32, #tpu.memory_space<vmem>>, vector<128x128xf32>,
    return
  }
  func.func @transform_0(%arg0: i32) -> (i32, i32) {
    %c0_i32 = arith.constant 0 : i32
    %c0_i32_0 = arith.constant 0 : i32
    return %arg0, %c0_i32 : i32, i32
  }
  func.func @transform_1(%arg0: i32) -> (i32, i32) {
    %c0_i32 = arith.constant 0 : i32
    %c0_i32_0 = arith.constant 0 : i32
    %c0_i32_1 = arith.constant 0 : i32
    return %c0_i32, %c0_i32_0 : i32, i32
  }
  func.func @transform_2(%arg0: i32) -> (i32, i32) {
    %c0_i32 = arith.constant 0 : i32
    %c0_i32_0 = arith.constant 0 : i32
    %c0_i32_1 = arith.constant 0 : i32
    return %c0_i32, %c0_i32_0 : i32, i32
  }
  func.func @transform_3(%arg0: i32) -> (i32, i32) {
    %c0_i32 = arith.constant 0 : i32
    %c0_i32_0 = arith.constant 0 : i32
    %c0_i32_1 = arith.constant 0 : i32
    return %c0_i32, %c0_i32_0 : i32, i32
  }
  func.func @transform_4(%arg0: i32) -> (i32, i32) {
    %c0_i32 = arith.constant 0 : i32
    %c0_i32_0 = arith.constant 0 : i32
    %c0_i32_1 = arith.constant 0 : i32
    return %c0_i32, %c0_i32_0 : i32, i32
  }
  func.func @transform_5(%arg0: i32) -> (i32, i32) {
    %c0_i32 = arith.constant 0 : i32
    %c0_i32_0 = arith.constant 0 : i32
    return %arg0, %c0_i32 : i32, i32
  }
}

</mosaic_0001>

<bundles_post_ra>
// kernel: tpu_custom_call.1
= control target key start
LH: loop header
LB: loop body
LE: loop exit
PB: predicated region body
PF: predicated region fallthrough
CT: control target
= control target key end

     0   :  { %10 = vsyncpa [#allocation3], 0  ;;  %s1414_s0 = inlined_call_operand.hbm [shape: f32[256,128], index: 0, kind: input, shape index: {}]   ;;  %s1415_s1 = inlined_call_operand.hbm [shape: f32[128,256], index: 1, kind: input, shape index: {}]   ;;  %s1416_s2 = inlined_call_operand.hbm [shape: f32[1,256], index: 2, kind: input, shape index: {}]   ;;  %s1417_s3 = inlined_call_operand.hbm [shape: f32[256,128], index: 3, kind: input, shape index: {}]   ;;  %s1418_s4 = inlined_call_operand.vmem [shape: f32[1,128], index: 4, kind: input, shape index: {}]   ;;  %s1419_s5 = inlined_call_operand.hbm [shape: f32[256,128], index: 5, kind: output, shape index: {}]  }
   0x1   :  { %12 = vsyncpa [#allocation3 + $0x1], 0 }
   0x2   :  { %13 = vsyncpa [#allocation6], 0 }
   0x3   :  { %14 = vsyncpa [#allocation9], 0 }
   0x4   :  { %15 = vsyncpa [#allocation4], 0 }
   0x5   :  { %17 = vsyncpa [#allocation4 + $0x1], 0  ;;  %s1152_s18 = smov 0   ;;  %s1154_s19 = smov 0  }
   0x6   :  { %s1156_s20 = smov 0   ;;  %s1158_s21 = smov 0  }
   0x7 LB: > { %s1173_s22 = sadd.s32 4294967295, %s1111_s21   ;;  %s811_s23 = sadd.s32 4294967294, %s1111_s21   ;;  %s1111_s21 = sphi %s1158_s21, %s1432_s21   ;;  %s1107_s20 = sphi %s1156_s20, %s1431_s20   ;;  %s1103_s19 = sphi %s1154_s19, %s1430_s19   ;;  %s1099_s18 = sphi %s1152_s18, %s1429_s18  }
   0x8   : > { %p43_p0 = scmp.ne.s32.totalorder %s1103_s19, %s1099_s18  ;;  %p44_p1 = scmp.eq.s32.totalorder %s1173_s22, 0 }
   0x9   : > { %p151_p2 = scmp.eq.s32.totalorder %s1173_s22, 1  ;;  %p157_p3 = scmp.eq.s32.totalorder %s811_s23, 1 }
   0xa   : > { %p1182_p4 = por %p44_p1, %p43_p0  ;;  %p812_p5 = scmp.ge.s32.totalorder %s1111_s21, 1 }
   0xb   : > { %p1187_p6 = por %p157_p3, %p43_p0  ;;  %p164_p7 = scmp.lt.s32.totalorder %s1111_s21, 3 }
   0xc   : > { %s175_s28 = sshll.u32 %s1415_s1, 4  ;;  %s1113_s30 = smov [#allocation5]   ;;  %s176_s28 = int_to_ptr.hbm [resolvable:$true] %s175_s28 }
   0xd   : > { %p1195_p8 = pnand %p812_p5, %p164_p7  ;;  %s177_s6 = sshll.u32 %s1113_s30, 4  ;;  %s178_s6 = int_to_ptr.vmem [resolvable:$true] %s177_s6 }
   0xe   : > { %s190_s10 = sshll.u32 %s1416_s2, 4  ;;  %s1114_s11 = smov 256   ;;  %s191_s10 = int_to_ptr.hbm [resolvable:$true] %s190_s10 }
   0xf   : > { %p849_p9 = pneg %p1195_p8  ;;  %s1115_s12 = smov 16  }
  0x10   : > { %s1116_s13 = smov [#allocation7]   ;;  %s201_s17 = sshll.u32 %s1417_s3, 4  ;;  %s202_s17 = int_to_ptr.hbm [resolvable:$true] %s201_s17 }
  0x11   : > { %p1203_p10 = pnand %p849_p9, %p44_p1  ;;  %s192_s14 = sshll.u32 %s1116_s13, 4  ;;  %s193_s14 = int_to_ptr.vmem [resolvable:$true] %s192_s14 }
  0x12   : > { %s1117_s23 = smov [#allocation8]   ;;  %s1420_s27 = smov 128  }
  0x13   : > { %852 = dma.hbm_to_vmem [thread:$0]  (!%p1203_p10), %s176_s28, 4096, %s178_s6, [#allocation6], %s1114_s11, %s1114_s11, %s1115_s12  }
  0x14   : > { %855 = dma.hbm_to_vmem [thread:$0]  (!%p1203_p10), %s191_s10, 32, %s193_s14, [#allocation6]  }
  0x15   : > { %s203_s26 = sshll.u32 %s1117_s23, 4  ;;  %s1119_s28 = smov 8   ;;  %s204_s26 = int_to_ptr.vmem [resolvable:$true] %s203_s26 }
  0x16   : > { %858 = dma.hbm_to_vmem [thread:$0]  (!%p1203_p10), %s202_s17, 4096, %s204_s26, [#allocation9], %s1420_s27, %s1420_s27, %s1119_s28  }
  0x17   : > { %s1224_s30 = sadd.s32 1, %s1111_s21   ;;  %s30_s8 = sadd.s32 1, %s1107_s20 }
  0x18   : > { %s27_s6 = ssub.s32 %s1111_s21, %s1224_s30  ;;  %p37_p13 = scmp.ne.s32.totalorder %s1107_s20, %s1103_s19 }
  0x19   : > { %p28_p12 = scmp.eq.s32.totalorder %s27_s6, 0  ;;  %p38_p0 = scmp.eq.s32.totalorder %s1111_s21, 0 }
  0x1a   : > { %p1237_p3 = por %p151_p2, %p37_p13  ;;  %p870_p5 = scmp.lt.s32.totalorder %s1111_s21, 2 }
  0x1b   : > { %s1233_s9 = scalar_select %p28_p12, %s1107_s20, %s30_s8  }
  0x1c   : > { %s220_s7 = sand.u32 1, %s1107_s20   ;;  %s831_s11 = sshll.u32 %s1111_s21, 7 }
  0x1d   : > { %p39_p7 = por %p38_p0, %p37_p13  ;;  %s817_s12 = sshll.u32 %s220_s7, 7 }
  0x1e   : > { %s229_s15 = scalar_lea.hbm %s1414_s0, %s831_s11  ;;  %s224_s17 = scalar_lea.vmem [#allocation2], %s817_s12 }
  0x1f   : > { %s230_s16 = sshll.u32 %s229_s15, 4  ;;  %s232_s23 = sshll.u32 %s224_s17, 4  ;;  %s231_s16 = int_to_ptr.hbm [resolvable:$true] %s230_s16  ;;  %s233_s23 = int_to_ptr.vmem [resolvable:$true] %s232_s23 }
  0x20   : > { %p1247_p9 = pnand %p870_p5, %p39_p7  ;;  %s221_s6 = scalar_lea.sflag [#allocation3], %s220_s7 }
  0x21   : > { %s1007_s8 = sshra.s32 %s231_s16, 4  ;;  %s1014_s12 = scalar_lea.hbm %s1414_s0, 256  ;;  %s1008_s8 = int_to_ptr.hbm [resolvable:$true] %s1007_s8 }
  0x22   : > { %s1009_s27 = scalar_lea.hbm %s1008_s8, 128  ;;  %p1011_p10 = pneg %p1247_p9 }
  0x23   : > { %p1010_p2 = scmp.ne.s32.totalorder %s1008_s8, %s1009_s27  ;;  %p1015_p0 = scmp.lt.s32.totalorder %s1008_s8, %s1414_s0 }
  0x24   : > { %p1016_p5 = scmp.lt.s32.totalorder %s1014_s12, %s1009_s27 }
  0x25   : > { %p1012_p12 = pnand %p1011_p10, %p1010_p2 }
  0x26   : > { %p1017_p7 = por %p1016_p5, %p1015_p0 }
  0x27   : > { %p1013_p13 = pneg %p1012_p12 }
  0x29   : > { %p1018_p11 = pnand %p1017_p7, %p1013_p13 }
  0x2b   : > { %1021 = shalt.err (!%p1018_p11)
}
  0x2c   : > { %s1427_s7 = smov 128   ;;  %244 = sbr.rel (%p1195_p8) target bundleno = 476 (0x1dc), region = 40 }
  0x2d   : > { %862 = dma.hbm_to_vmem [thread:$0]  (!%p1247_p9), %s231_s16, 2048, %s233_s23, %s221_s6, %s1427_s7, %s1427_s7, %s1119_s28  }
  0x2e   : > { %s1267_s17 = sand.u32 (!%p1195_p8), 1, %s1103_s19  }
  0x2f   : > { %s821_s27 = sshll.u32 (!%p1195_p8), %s1267_s17, 7  ;;  %s247_s8 = scalar_lea.sflag (!%p1195_p8), [#allocation3], %s1267_s17 }
  0x30   : > { %s1273_s11 = scalar_lea.vmem (!%p1195_p8), [#allocation2], %s821_s27 }
  0x31   : > { %1082 = dma.done.wait (%p1182_p4), %s247_s8, 2048  }
  0x32   : > { %1084 = vsyncadd (%p1182_p4), %s247_s8, 4294965248 }
  0x33   : > { %1086 = dma.done.wait (%p44_p1), [#allocation6], 4128  }
  0x34   : > { %1088 = vsyncadd (%p44_p1), [#allocation6], 4294963168 }
  0x35   : > { %1090 = dma.done.wait (%p44_p1), [#allocation9], 4096  }
  0x36   : > { %1092 = vsyncadd (%p44_p1), [#allocation9], 4294963200  ;;  %v341_v0 = vld [vmem:[#allocation5 + $0xf0] sm:$0xff]  ;;  %v339_v1 = vld [vmem:[#allocation5 + $0xe0] sm:$0xff]  ;;  %s1347_s28 = scalar_lea.vmem [#allocation10], %s821_s27  ;;  %s832_s16 = sshll.u32 %s1173_s22, 7 }
  0x37   : > { %v342_v2 = vld [vmem:[#allocation5 + $0xf8] sm:$0xff]  ;;  %349 = vmatpush.msra.mxu0 %v341_v0  ;;  %v340_v3 = vld [vmem:[#allocation5 + $0xe8] sm:$0xff]  ;;  %v337_v4 = vld [vmem:[#allocation5 + $0xd0] sm:$0xff]  ;;  %s705_s6 = scalar_lea.hbm %s1419_s5, %s832_s16  ;;  %s706_s13 = sshll.u32 %s1347_s28, 4  ;;  %s707_s13 = int_to_ptr.vmem [resolvable:$true] %s706_s13 }
  0x38   : > { %414 = vmatpush.msra.mxu1 %v342_v2  ;;  %v338_v5 = vld [vmem:[#allocation5 + $0xd8] sm:$0xff]  ;;  %v335_v6 = vld [vmem:[#allocation5 + $0xc0] sm:$0xff]  ;;  %v336_v7 = vld [vmem:[#allocation5 + $0xc8] sm:$0xff]  ;;  %s708_s12 = sshll.u32 %s705_s6, 4  ;;  %s694_s14 = scalar_lea.sflag [#allocation4], %s1267_s17  ;;  %s709_s12 = int_to_ptr.hbm [resolvable:$true] %s708_s12 }
  0x39   : > { %350 = vmatpush.msra.mxu0 %v339_v1  ;;  %v333_v8 = vld [vmem:[#allocation5 + $0xb0] sm:$0xff]  ;;  %v334_v9 = vld [vmem:[#allocation5 + $0xb8] sm:$0xff]  ;;  %v331_v10 = vld [vmem:[#allocation5 + $0xa0] sm:$0xff]  ;;  %s1051_s15 = sshra.s32 %s709_s12, 4  ;;  %s1057_s8 = scalar_lea.hbm %s1419_s5, 256  ;;  %s1052_s15 = int_to_ptr.hbm [resolvable:$true] %s1051_s15 }
  0x3a   : > { %415 = vmatpush.msra.mxu1 %v340_v3  ;;  %v332_v11 = vld [vmem:[#allocation5 + $0xa8] sm:$0xff]  ;;  %v329_v12 = vld [vmem:[#allocation5 + $0x90] sm:$0xff]  ;;  %v330_v13 = vld [vmem:[#allocation5 + $0x98] sm:$0xff]  ;;  %s1053_s22 = scalar_lea.hbm %s1052_s15, 128  ;;  %p1058_p11 = scmp.lt.s32.totalorder %s1052_s15, %s1419_s5 }
  0x3b   : > { %351 = vmatpush.msra.mxu0 %v337_v4  ;;  %v327_v14 = vld [vmem:[#allocation5 + $0x80] sm:$0xff]  ;;  %v328_v15 = vld [vmem:[#allocation5 + $0x88] sm:$0xff]  ;;  %v325_v16 = vld [vmem:[#allocation5 + $0x70] sm:$0xff]  ;;  %p1054_p1 = scmp.ne.s32.totalorder %s1052_s15, %s1053_s22  ;;  %p1059_p9 = scmp.lt.s32.totalorder %s1057_s8, %s1053_s22 }
  0x3c   : > { %416 = vmatpush.msra.mxu1 %v338_v5  ;;  %v326_v17 = vld [vmem:[#allocation5 + $0x78] sm:$0xff]  ;;  %v323_v18 = vld [vmem:[#allocation5 + $0x60] sm:$0xff]  ;;  %v324_v19 = vld [vmem:[#allocation5 + $0x68] sm:$0xff] }
  0x3d   : > { %352 = vmatpush.msra.mxu0 %v335_v6  ;;  %v321_v20 = vld [vmem:[#allocation5 + $0x50] sm:$0xff]  ;;  %v322_v21 = vld [vmem:[#allocation5 + $0x58] sm:$0xff]  ;;  %v319_v22 = vld [vmem:[#allocation5 + $0x40] sm:$0xff]  ;;  %p1055_p4 = pnand %p1054_p1, %p1237_p3  ;;  %p1060_p2 = por %p1059_p9, %p1058_p11 }
  0x3e   : > { %417 = vmatpush.msra.mxu1 %v336_v7  ;;  %v320_v23 = vld [vmem:[#allocation5 + $0x48] sm:$0xff]  ;;  %v317_v24 = vld [vmem:[#allocation5 + $0x30] sm:$0xff]  ;;  %v318_v25 = vld [vmem:[#allocation5 + $0x38] sm:$0xff] }
  0x3f   : > { %353 = vmatpush.msra.mxu0 %v333_v8  ;;  %v315_v26 = vld [vmem:[#allocation5 + $0x20] sm:$0xff]  ;;  %v316_v27 = vld [vmem:[#allocation5 + $0x28] sm:$0xff]  ;;  %v313_v28 = vld [vmem:[#allocation5 + $0x10] sm:$0xff]  ;;  %p1056_p8 = pneg %p1055_p4 }
  0x40   : > { %418 = vmatpush.msra.mxu1 %v334_v9  ;;  %v314_v29 = vld [vmem:[#allocation5 + $0x18] sm:$0xff]  ;;  %v311_v30 = vld [vmem:[#allocation5] sm:$0xff]  ;;  %v312_v31 = vld [vmem:[#allocation5 + $0x8] sm:$0xff] }
  0x41   : > { %354 = vmatpush.msra.mxu0 %v331_v10  ;;  %v295_v32 = vld [vmem:[%s1273_s11] sm:$0xff]  ;;  %v296_v33 = vld [vmem:[%s1273_s11 + $0x8] sm:$0xff]  ;;  %v297_v34 = vld [vmem:[%s1273_s11 + $0x10] sm:$0xff]  ;;  %p1061_p10 = pnand %p1060_p2, %p1056_p8 }
  0x42   : > { %419 = vmatpush.msra.mxu1 %v332_v11  ;;  %v298_v35 = vld [vmem:[%s1273_s11 + $0x18] sm:$0xff]  ;;  %v299_v36 = vld [vmem:[%s1273_s11 + $0x20] sm:$0xff]  ;;  %v300_v37 = vld [vmem:[%s1273_s11 + $0x28] sm:$0xff] }
  0x43   : > { %355 = vmatpush.msra.mxu0 %v329_v12  ;;  %v301_v38 = vld [vmem:[%s1273_s11 + $0x30] sm:$0xff]  ;;  %v302_v39 = vld [vmem:[%s1273_s11 + $0x38] sm:$0xff]  ;;  %v303_v40 = vld [vmem:[%s1273_s11 + $0x40] sm:$0xff] }
  0x44   : > { %420 = vmatpush.msra.mxu1 %v330_v13  ;;  %v526_v41 = vld [vmem:[#allocation8 + $0x78] sm:$0xff]  ;;  %v525_v42 = vld [vmem:[#allocation8 + $0x70] sm:$0xff]  ;;  %v524_v45 = vld [vmem:[#allocation8 + $0x68] sm:$0xff] }
  0x45   : > { %356 = vmatpush.msra.mxu0 %v327_v14  ;;  %v542_v43 = vld [vmem:[#allocation8 + $0xf8] sm:$0xff]  ;;  %547 = vmatpush.msra.mxu2 %v526_v41  ;;  %v541_v44 = vld [vmem:[#allocation8 + $0xf0] sm:$0xff]  ;;  %v304_v46 = vld [vmem:[%s1273_s11 + $0x48] sm:$0xff] }
  0x46   : > { %421 = vmatpush.msra.mxu1 %v328_v15  ;;  %612 = vmatpush.msra.mxu3 %v542_v43  ;;  %v523_v47 = vld [vmem:[#allocation8 + $0x60] sm:$0xff]  ;;  %v540_v48 = vld [vmem:[#allocation8 + $0xe8] sm:$0xff]  ;;  %v522_v49 = vld [vmem:[#allocation8 + $0x58] sm:$0xff] }
  0x47   : > { %357 = vmatpush.msra.mxu0 %v325_v16  ;;  %548 = vmatpush.msra.mxu2 %v525_v42  ;;  %v539_v50 = vld [vmem:[#allocation8 + $0xe0] sm:$0xff]  ;;  %v521_v51 = vld [vmem:[#allocation8 + $0x50] sm:$0xff]  ;;  %v538_v52 = vld [vmem:[#allocation8 + $0xd8] sm:$0xff] }
  0x48   : > { %422 = vmatpush.msra.mxu1 %v326_v17  ;;  %613 = vmatpush.msra.mxu3 %v541_v44  ;;  %v520_v53 = vld [vmem:[#allocation8 + $0x48] sm:$0xff]  ;;  %v537_v54 = vld [vmem:[#allocation8 + $0xd0] sm:$0xff]  ;;  %v519_v56 = vld [vmem:[#allocation8 + $0x40] sm:$0xff] }
  0x49   : > { %358 = vmatpush.msra.mxu0 %v323_v18  ;;  %549 = vmatpush.msra.mxu2 %v524_v45  ;;  %v305_v55 = vld [vmem:[%s1273_s11 + $0x50] sm:$0xff]  ;;  %v518_v58 = vld [vmem:[#allocation8 + $0x38] sm:$0xff]  ;;  %v535_v59 = vld [vmem:[#allocation8 + $0xc0] sm:$0xff] }
  0x4a   : > { %423 = vmatpush.msra.mxu1 %v324_v19  ;;  %614 = vmatpush.msra.mxu3 %v540_v48  ;;  %v536_v57 = vld [vmem:[#allocation8 + $0xc8] sm:$0xff]  ;;  %v517_v60 = vld [vmem:[#allocation8 + $0x30] sm:$0xff]  ;;  %v534_v61 = vld [vmem:[#allocation8 + $0xb8] sm:$0xff] }
  0x4b   : > { %359 = vmatpush.msra.mxu0 %v321_v20  ;;  %550 = vmatpush.msra.mxu2 %v523_v47  ;;  %v516_v62 = vld [vmem:[#allocation8 + $0x28] sm:$0xff]  ;;  %v533_v63 = vld [vmem:[#allocation8 + $0xb0] sm:$0xff]  ;;  %v515_v1 = vld [vmem:[#allocation8 + $0x20] sm:$0xff] }
  0x4c   : > { %424 = vmatpush.msra.mxu1 %v322_v21  ;;  %615 = vmatpush.msra.mxu3 %v539_v50  ;;  %v306_v0 = vld [vmem:[%s1273_s11 + $0x58] sm:$0xff]  ;;  %v532_v2 = vld [vmem:[#allocation8 + $0xa8] sm:$0xff]  ;;  %v531_v4 = vld [vmem:[#allocation8 + $0xa0] sm:$0xff] }
  0x4d   : > { %360 = vmatpush.msra.mxu0 %v319_v22  ;;  %551 = vmatpush.msra.mxu2 %v522_v49  ;;  %v514_v3 = vld [vmem:[#allocation8 + $0x18] sm:$0xff]  ;;  %v513_v5 = vld [vmem:[#allocation8 + $0x10] sm:$0xff]  ;;  %v512_v8 = vld [vmem:[#allocation8 + $0x8] sm:$0xff] }
  0x4e   : > { %425 = vmatpush.msra.mxu1 %v320_v23  ;;  %616 = vmatpush.msra.mxu3 %v538_v52  ;;  %v530_v6 = vld [vmem:[#allocation8 + $0x98] sm:$0xff]  ;;  %v529_v9 = vld [vmem:[#allocation8 + $0x90] sm:$0xff]  ;;  %v511_v10 = vld [vmem:[#allocation8] sm:$0xff] }
  0x4f   : > { %361 = vmatpush.msra.mxu0 %v317_v24  ;;  %552 = vmatpush.msra.mxu2 %v521_v51  ;;  %v307_v7 = vld [vmem:[%s1273_s11 + $0x60] sm:$0xff]  ;;  %v528_v11 = vld [vmem:[#allocation8 + $0x88] sm:$0xff]  ;;  %v310_v15 = vld [vmem:[%s1273_s11 + $0x78] sm:$0xff] }
  0x50   : > { %426 = vmatpush.msra.mxu1 %v318_v25  ;;  %617 = vmatpush.msra.mxu3 %v537_v54  ;;  %v527_v12 = vld [vmem:[#allocation8 + $0x80] sm:$0xff]  ;;  %v309_v14 = vld [vmem:[%s1273_s11 + $0x70] sm:$0xff]  ;;  %v343_v16 = vld [vmem:[#allocation7] sm:$0x3] }
  0x51   : > { %362 = vmatpush.msra.mxu0 %v315_v26  ;;  %553 = vmatpush.msra.mxu2 %v520_v53  ;;  %v308_v13 = vld [vmem:[%s1273_s11 + $0x68] sm:$0xff]  ;;  %v1303_v17 = vperm.slane %v343_v16, 0  ;;  %v1305_v18 = vperm.slane %v343_v16, 1 }
  0x52   : > { %427 = vmatpush.msra.mxu1 %v316_v27  ;;  %618 = vmatpush.msra.mxu3 %v536_v57 }
  0x53   : > { %363 = vmatpush.msra.mxu0 %v313_v28  ;;  %554 = vmatpush.msra.mxu2 %v519_v56 }
  0x54   : > { %428 = vmatpush.msra.mxu1 %v314_v29  ;;  %619 = vmatpush.msra.mxu3 %v535_v59 }
  0x55   : > { %364 = vmatpush.msra.mxu0 %v311_v30  ;;  %555 = vmatpush.msra.mxu2 %v518_v58 }
  0x56   : > { %429 = vmatpush.msra.mxu1 %v312_v31  ;;  %365 = vmatmul.f32.vlgmr.msra.gmra.mxu0 %v295_v32 }
  0x57   : > { %430 = vmatmul.f32.vlgmr.msra.gmra.mxu1 %v295_v32  ;;  %556 = vmatpush.msra.mxu2 %v517_v60 }
  0x58   : > { %620 = vmatpush.msra.mxu3 %v534_v61 }
  0x59   : > { %557 = vmatpush.msra.mxu2 %v516_v62 }
  0x5a   : > { %621 = vmatpush.msra.mxu3 %v533_v63 }
  0x5b   : > { %558 = vmatpush.msra.mxu2 %v515_v1 }
  0x5c   : > { %622 = vmatpush.msra.mxu3 %v532_v2 }
  0x5d   : > { %559 = vmatpush.msra.mxu2 %v514_v3 }
  0x5e   : > { %368 = vmatmul.f32.gmra.mxu0 %v296_v33  ;;  %623 = vmatpush.msra.mxu3 %v531_v4 }
  0x5f   : > { %433 = vmatmul.f32.gmra.mxu1 %v296_v33  ;;  %560 = vmatpush.msra.mxu2 %v513_v5 }
  0x60   : > { %624 = vmatpush.msra.mxu3 %v530_v6 }
  0x61   : > { %561 = vmatpush.msra.mxu2 %v512_v8 }
  0x62   : > { %625 = vmatpush.msra.mxu3 %v529_v9 }
  0x63   : > { %562 = vmatpush.msra.mxu2 %v511_v10 }
  0x64   : > { %626 = vmatpush.msra.mxu3 %v528_v11 }
  0x66   : > { %371 = vmatmul.f32.gmra.mxu0 %v297_v34  ;;  %627 = vmatpush.msra.mxu3 %v527_v12 }
  0x67   : > { %436 = vmatmul.f32.gmra.mxu1 %v297_v34 }
  0x6e   : > { %374 = vmatmul.f32.gmra.mxu0 %v298_v35 }
  0x6f   : > { %439 = vmatmul.f32.gmra.mxu1 %v298_v35 }
  0x76   : > { %377 = vmatmul.f32.gmra.mxu0 %v299_v36 }
  0x77   : > { %442 = vmatmul.f32.gmra.mxu1 %v299_v36 }
  0x7e   : > { %380 = vmatmul.f32.gmra.mxu0 %v300_v37 }
  0x7f   : > { %445 = vmatmul.f32.gmra.mxu1 %v300_v37 }
  0x86   : > { %383 = vmatmul.f32.gmra.mxu0 %v301_v38 }
  0x87   : > { %448 = vmatmul.f32.gmra.mxu1 %v301_v38 }
  0x8e   : > { %386 = vmatmul.f32.gmra.mxu0 %v302_v39 }
  0x8f   : > { %451 = vmatmul.f32.gmra.mxu1 %v302_v39 }
  0x96   : > { %389 = vmatmul.f32.gmra.mxu0 %v303_v40 }
  0x97   : > { %454 = vmatmul.f32.gmra.mxu1 %v303_v40 }
  0x9e   : > { %392 = vmatmul.f32.gmra.mxu0 %v304_v46 }
  0x9f   : > { %457 = vmatmul.f32.gmra.mxu1 %v304_v46 }
  0xa6   : > { %395 = vmatmul.f32.gmra.mxu0 %v305_v55 }
  0xa7   : > { %460 = vmatmul.f32.gmra.mxu1 %v305_v55 }
  0xae   : > { %398 = vmatmul.f32.gmra.mxu0 %v306_v0 }
  0xaf   : > { %463 = vmatmul.f32.gmra.mxu1 %v306_v0 }
  0xb6   : > { %401 = vmatmul.f32.gmra.mxu0 %v307_v7 }
  0xb7   : > { %466 = vmatmul.f32.gmra.mxu1 %v307_v7 }
  0xbe   : > { %404 = vmatmul.f32.gmra.mxu0 %v308_v13 }
  0xbf   : > { %469 = vmatmul.f32.gmra.mxu1 %v308_v13 }
  0xc6   : > { %407 = vmatmul.f32.gmra.mxu0 %v309_v14 }
  0xc7   : > { %472 = vmatmul.f32.gmra.mxu1 %v309_v14 }
  0xce   : > { %410 = vmatmul.f32.gmra.mxu0 %v310_v15 }
  0xcf   : > { %475 = vmatmul.f32.gmra.mxu1 %v310_v15 }
  0xd3   : > { %v366_v19 = vpop.f32.mrf.mxu0 }
  0xd4   : > { %v431_v20 = vpop.f32.mrf.mxu1  ;;  %v367_v21 = vadd.f32 %v366_v19, %v1303_v17 }
  0xd5   : > { %v432_v22 = vadd.f32 %v431_v20, %v1305_v18 }
  0xd6   : > { %v479_v23 = vmax.f32 %v367_v21, 0.0 }
  0xd7   : > { %v480_v24 = vmax.f32 %v432_v22, 0.0 }
  0xd8   : > { %563 = vmatmul.f32.vlgmr.msra.gmra.mxu2 %v479_v23 }
  0xd9   : > { %628 = vmatmul.f32.vlgmr.msra.gmra.mxu3 %v480_v24 }
  0xdb   : > { %v369_v25 = vpop.f32.mrf.mxu0 }
  0xdc   : > { %v434_v26 = vpop.f32.mrf.mxu1  ;;  %v370_v27 = vadd.f32 %v369_v25, %v1303_v17 }
  0xdd   : > { %v435_v28 = vadd.f32 %v434_v26, %v1305_v18 }
  0xde   : > { %v481_v29 = vmax.f32 %v370_v27, 0.0 }
  0xdf   : > { %v482_v30 = vmax.f32 %v435_v28, 0.0 }
  0xe0   : > { %566 = vmatmul.f32.gmra.mxu2 %v481_v29 }
  0xe1   : > { %631 = vmatmul.f32.gmra.mxu3 %v482_v30 }
  0xe3   : > { %v372_v31 = vpop.f32.mrf.mxu0 }
  0xe4   : > { %v437_v32 = vpop.f32.mrf.mxu1  ;;  %v373_v33 = vadd.f32 %v372_v31, %v1303_v17 }
  0xe5   : > { %v438_v34 = vadd.f32 %v437_v32, %v1305_v18 }
  0xe6   : > { %v483_v35 = vmax.f32 %v373_v33, 0.0 }
  0xe7   : > { %v484_v36 = vmax.f32 %v438_v34, 0.0 }
  0xe8   : > { %569 = vmatmul.f32.gmra.mxu2 %v483_v35 }
  0xe9   : > { %634 = vmatmul.f32.gmra.mxu3 %v484_v36 }
  0xeb   : > { %v375_v37 = vpop.f32.mrf.mxu0 }
  0xec   : > { %v440_v38 = vpop.f32.mrf.mxu1  ;;  %v376_v39 = vadd.f32 %v375_v37, %v1303_v17 }
  0xed   : > { %v441_v40 = vadd.f32 %v440_v38, %v1305_v18 }
  0xee   : > { %v485_v41 = vmax.f32 %v376_v39, 0.0 }
  0xef   : > { %v486_v42 = vmax.f32 %v441_v40, 0.0 }
  0xf0   : > { %572 = vmatmul.f32.gmra.mxu2 %v485_v41 }
  0xf1   : > { %637 = vmatmul.f32.gmra.mxu3 %v486_v42 }
  0xf3   : > { %v378_v43 = vpop.f32.mrf.mxu0 }
  0xf4   : > { %v443_v44 = vpop.f32.mrf.mxu1  ;;  %v379_v45 = vadd.f32 %v378_v43, %v1303_v17 }
  0xf5   : > { %v444_v46 = vadd.f32 %v443_v44, %v1305_v18 }
  0xf6   : > { %v487_v47 = vmax.f32 %v379_v45, 0.0 }
  0xf7   : > { %v488_v48 = vmax.f32 %v444_v46, 0.0 }
  0xf8   : > { %575 = vmatmul.f32.gmra.mxu2 %v487_v47 }
  0xf9   : > { %640 = vmatmul.f32.gmra.mxu3 %v488_v48 }
  0xfb   : > { %v381_v49 = vpop.f32.mrf.mxu0 }
  0xfc   : > { %v446_v50 = vpop.f32.mrf.mxu1  ;;  %v382_v51 = vadd.f32 %v381_v49, %v1303_v17 }
  0xfd   : > { %v447_v52 = vadd.f32 %v446_v50, %v1305_v18 }
  0xfe   : > { %v489_v53 = vmax.f32 %v382_v51, 0.0 }
  0xff   : > { %v490_v54 = vmax.f32 %v447_v52, 0.0 }
 0x100   : > { %578 = vmatmul.f32.gmra.mxu2 %v489_v53  ;;  %v1342_v53 = vld [vmem:[%s1418_s4] ss:$0 sm:$0xff] }
 0x101   : > { %643 = vmatmul.f32.gmra.mxu3 %v490_v54 }
 0x103   : > { %v384_v55 = vpop.f32.mrf.mxu0 }
 0x104   : > { %v449_v56 = vpop.f32.mrf.mxu1  ;;  %v385_v57 = vadd.f32 %v384_v55, %v1303_v17 }
 0x105   : > { %v450_v58 = vadd.f32 %v449_v56, %v1305_v18 }
 0x106   : > { %v491_v59 = vmax.f32 %v385_v57, 0.0 }
 0x107   : > { %v492_v60 = vmax.f32 %v450_v58, 0.0 }
 0x108   : > { %581 = vmatmul.f32.gmra.mxu2 %v491_v59 }
 0x109   : > { %646 = vmatmul.f32.gmra.mxu3 %v492_v60 }
 0x10b   : > { %v387_v61 = vpop.f32.mrf.mxu0 }
 0x10c   : > { %v452_v62 = vpop.f32.mrf.mxu1  ;;  %v388_v63 = vadd.f32 %v387_v61, %v1303_v17 }
 0x10d   : > { %v453_v0 = vadd.f32 %v452_v62, %v1305_v18 }
 0x10e   : > { %v493_v1 = vmax.f32 %v388_v63, 0.0 }
 0x10f   : > { %v494_v2 = vmax.f32 %v453_v0, 0.0 }
 0x110   : > { %584 = vmatmul.f32.gmra.mxu2 %v493_v1 }
 0x111   : > { %649 = vmatmul.f32.gmra.mxu3 %v494_v2 }
 0x113   : > { %v390_v3 = vpop.f32.mrf.mxu0 }
 0x114   : > { %v455_v4 = vpop.f32.mrf.mxu1  ;;  %v391_v5 = vadd.f32 %v390_v3, %v1303_v17 }
 0x115   : > { %v456_v6 = vadd.f32 %v455_v4, %v1305_v18 }
 0x116   : > { %v495_v7 = vmax.f32 %v391_v5, 0.0 }
 0x117   : > { %v496_v8 = vmax.f32 %v456_v6, 0.0 }
 0x118   : > { %587 = vmatmul.f32.gmra.mxu2 %v495_v7 }
 0x119   : > { %652 = vmatmul.f32.gmra.mxu3 %v496_v8 }
 0x11b   : > { %v393_v9 = vpop.f32.mrf.mxu0 }
 0x11c   : > { %v458_v10 = vpop.f32.mrf.mxu1  ;;  %v394_v11 = vadd.f32 %v393_v9, %v1303_v17 }
 0x11d   : > { %v459_v12 = vadd.f32 %v458_v10, %v1305_v18 }
 0x11e   : > { %v497_v13 = vmax.f32 %v394_v11, 0.0 }
 0x11f   : > { %v498_v14 = vmax.f32 %v459_v12, 0.0 }
 0x120   : > { %590 = vmatmul.f32.gmra.mxu2 %v497_v13 }
 0x121   : > { %655 = vmatmul.f32.gmra.mxu3 %v498_v14 }
 0x123   : > { %v396_v15 = vpop.f32.mrf.mxu0 }
 0x124   : > { %v461_v16 = vpop.f32.mrf.mxu1  ;;  %v397_v19 = vadd.f32 %v396_v15, %v1303_v17 }
 0x125   : > { %v462_v20 = vadd.f32 %v461_v16, %v1305_v18 }
 0x126   : > { %v499_v21 = vmax.f32 %v397_v19, 0.0 }
 0x127   : > { %v500_v22 = vmax.f32 %v462_v20, 0.0 }
 0x128   : > { %593 = vmatmul.f32.gmra.mxu2 %v499_v21 }
 0x129   : > { %658 = vmatmul.f32.gmra.mxu3 %v500_v22 }
 0x12b   : > { %v399_v23 = vpop.f32.mrf.mxu0 }
 0x12c   : > { %v464_v24 = vpop.f32.mrf.mxu1  ;;  %v400_v25 = vadd.f32 %v399_v23, %v1303_v17 }
 0x12d   : > { %v465_v26 = vadd.f32 %v464_v24, %v1305_v18 }
 0x12e   : > { %v501_v27 = vmax.f32 %v400_v25, 0.0 }
 0x12f   : > { %v502_v28 = vmax.f32 %v465_v26, 0.0 }
 0x130   : > { %596 = vmatmul.f32.gmra.mxu2 %v501_v27 }
 0x131   : > { %661 = vmatmul.f32.gmra.mxu3 %v502_v28 }
 0x133   : > { %v402_v29 = vpop.f32.mrf.mxu0 }
 0x134   : > { %v467_v30 = vpop.f32.mrf.mxu1  ;;  %v403_v31 = vadd.f32 %v402_v29, %v1303_v17 }
 0x135   : > { %v468_v32 = vadd.f32 %v467_v30, %v1305_v18 }
 0x136   : > { %v503_v33 = vmax.f32 %v403_v31, 0.0 }
 0x137   : > { %v504_v34 = vmax.f32 %v468_v32, 0.0 }
 0x138   : > { %599 = vmatmul.f32.gmra.mxu2 %v503_v33 }
 0x139   : > { %664 = vmatmul.f32.gmra.mxu3 %v504_v34 }
 0x13b   : > { %v405_v35 = vpop.f32.mrf.mxu0 }
 0x13c   : > { %v470_v36 = vpop.f32.mrf.mxu1  ;;  %v406_v37 = vadd.f32 %v405_v35, %v1303_v17 }
 0x13d   : > { %v471_v38 = vadd.f32 %v470_v36, %v1305_v18 }
 0x13e   : > { %v505_v39 = vmax.f32 %v406_v37, 0.0 }
 0x13f   : > { %v506_v40 = vmax.f32 %v471_v38, 0.0 }
 0x140   : > { %602 = vmatmul.f32.gmra.mxu2 %v505_v39 }
 0x141   : > { %667 = vmatmul.f32.gmra.mxu3 %v506_v40 }
 0x143   : > { %v408_v41 = vpop.f32.mrf.mxu0 }
 0x144   : > { %v473_v42 = vpop.f32.mrf.mxu1  ;;  %v409_v43 = vadd.f32 %v408_v41, %v1303_v17 }
 0x145   : > { %v474_v44 = vadd.f32 %v473_v42, %v1305_v18 }
 0x146   : > { %v507_v45 = vmax.f32 %v409_v43, 0.0 }
 0x147   : > { %v508_v46 = vmax.f32 %v474_v44, 0.0 }
 0x148   : > { %605 = vmatmul.f32.gmra.mxu2 %v507_v45 }
 0x149   : > { %670 = vmatmul.f32.gmra.mxu3 %v508_v46 }
 0x14b   : > { %v411_v47 = vpop.f32.mrf.mxu0 }
 0x14c   : > { %v476_v48 = vpop.f32.mrf.mxu1  ;;  %v412_v49 = vadd.f32 %v411_v47, %v1303_v17 }
 0x14d   : > { %v477_v50 = vadd.f32 %v476_v48, %v1305_v18 }
 0x14e   : > { %v509_v51 = vmax.f32 %v412_v49, 0.0 }
 0x14f   : > { %v510_v52 = vmax.f32 %v477_v50, 0.0 }
 0x150   : > { %608 = vmatmul.f32.gmra.mxu2 %v509_v51 }
 0x151   : > { %673 = vmatmul.f32.gmra.mxu3 %v510_v52 }
 0x15b   : > { %v564_v54 = vpop.f32.mrf.mxu2 }
 0x15c   : > { %v629_v55 = vpop.f32.mrf.mxu3  ;;  %v565_v56 = vadd.f32 %v1342_v53, %v564_v54 }
 0x15e   : > { %v630_v57 = vadd.f32 %v629_v55, %v565_v56 }
 0x160   : > { %677 = vst [vmem:[%s1347_s28] sm:$0xff] %v630_v57 }
 0x163   : > { %v567_v17 = vpop.f32.mrf.mxu2 }
 0x164   : > { %v632_v18 = vpop.f32.mrf.mxu3  ;;  %v568_v58 = vadd.f32 %v1342_v53, %v567_v17 }
 0x166   : > { %v633_v59 = vadd.f32 %v632_v18, %v568_v58 }
 0x168   : > { %678 = vst [vmem:[%s1347_s28 + $0x8] sm:$0xff] %v633_v59 }
 0x16b   : > { %v570_v60 = vpop.f32.mrf.mxu2 }
 0x16c   : > { %v635_v61 = vpop.f32.mrf.mxu3  ;;  %v571_v62 = vadd.f32 %v1342_v53, %v570_v60 }
 0x16e   : > { %v636_v63 = vadd.f32 %v635_v61, %v571_v62 }
 0x170   : > { %679 = vst [vmem:[%s1347_s28 + $0x10] sm:$0xff] %v636_v63 }
 0x173   : > { %v573_v0 = vpop.f32.mrf.mxu2 }
 0x174   : > { %v638_v1 = vpop.f32.mrf.mxu3  ;;  %v574_v2 = vadd.f32 %v1342_v53, %v573_v0 }
 0x176   : > { %v639_v3 = vadd.f32 %v638_v1, %v574_v2 }
 0x178   : > { %680 = vst [vmem:[%s1347_s28 + $0x18] sm:$0xff] %v639_v3 }
 0x17b   : > { %v576_v4 = vpop.f32.mrf.mxu2 }
 0x17c   : > { %v641_v5 = vpop.f32.mrf.mxu3  ;;  %v577_v6 = vadd.f32 %v1342_v53, %v576_v4 }
 0x17e   : > { %v642_v7 = vadd.f32 %v641_v5, %v577_v6 }
 0x180   : > { %681 = vst [vmem:[%s1347_s28 + $0x20] sm:$0xff] %v642_v7 }
 0x183   : > { %v579_v8 = vpop.f32.mrf.mxu2 }
 0x184   : > { %v644_v9 = vpop.f32.mrf.mxu3  ;;  %v580_v10 = vadd.f32 %v1342_v53, %v579_v8 }
 0x186   : > { %v645_v11 = vadd.f32 %v644_v9, %v580_v10 }
 0x188   : > { %682 = vst [vmem:[%s1347_s28 + $0x28] sm:$0xff] %v645_v11 }
 0x18b   : > { %v582_v12 = vpop.f32.mrf.mxu2 }
 0x18c   : > { %v647_v13 = vpop.f32.mrf.mxu3  ;;  %v583_v14 = vadd.f32 %v1342_v53, %v582_v12 }
 0x18e   : > { %v648_v15 = vadd.f32 %v647_v13, %v583_v14 }
 0x190   : > { %683 = vst [vmem:[%s1347_s28 + $0x30] sm:$0xff] %v648_v15 }
 0x193   : > { %v585_v16 = vpop.f32.mrf.mxu2 }
 0x194   : > { %v650_v19 = vpop.f32.mrf.mxu3  ;;  %v586_v20 = vadd.f32 %v1342_v53, %v585_v16 }
 0x196   : > { %v651_v21 = vadd.f32 %v650_v19, %v586_v20 }
 0x198   : > { %684 = vst [vmem:[%s1347_s28 + $0x38] sm:$0xff] %v651_v21 }
 0x19b   : > { %v588_v22 = vpop.f32.mrf.mxu2 }
 0x19c   : > { %v653_v23 = vpop.f32.mrf.mxu3  ;;  %v589_v24 = vadd.f32 %v1342_v53, %v588_v22 }
 0x19e   : > { %v654_v25 = vadd.f32 %v653_v23, %v589_v24 }
 0x1a0   : > { %685 = vst [vmem:[%s1347_s28 + $0x40] sm:$0xff] %v654_v25 }
 0x1a3   : > { %v591_v26 = vpop.f32.mrf.mxu2 }
 0x1a4   : > { %v656_v27 = vpop.f32.mrf.mxu3  ;;  %v592_v28 = vadd.f32 %v1342_v53, %v591_v26 }
 0x1a6   : > { %v657_v29 = vadd.f32 %v656_v27, %v592_v28 }
 0x1a8   : > { %686 = vst [vmem:[%s1347_s28 + $0x48] sm:$0xff] %v657_v29 }
 0x1ab   : > { %v594_v30 = vpop.f32.mrf.mxu2 }
 0x1ac   : > { %v659_v31 = vpop.f32.mrf.mxu3  ;;  %v595_v32 = vadd.f32 %v1342_v53, %v594_v30 }
 0x1ae   : > { %v660_v33 = vadd.f32 %v659_v31, %v595_v32 }
 0x1b0   : > { %687 = vst [vmem:[%s1347_s28 + $0x50] sm:$0xff] %v660_v33 }
 0x1b3   : > { %v597_v34 = vpop.f32.mrf.mxu2 }
 0x1b4   : > { %v662_v35 = vpop.f32.mrf.mxu3  ;;  %v598_v36 = vadd.f32 %v1342_v53, %v597_v34 }
 0x1b6   : > { %v663_v37 = vadd.f32 %v662_v35, %v598_v36 }
 0x1b8   : > { %688 = vst [vmem:[%s1347_s28 + $0x58] sm:$0xff] %v663_v37 }
 0x1bb   : > { %v600_v38 = vpop.f32.mrf.mxu2 }
 0x1bc   : > { %v665_v39 = vpop.f32.mrf.mxu3  ;;  %v601_v40 = vadd.f32 %v1342_v53, %v600_v38 }
 0x1be   : > { %v666_v41 = vadd.f32 %v665_v39, %v601_v40 }
 0x1c0   : > { %689 = vst [vmem:[%s1347_s28 + $0x60] sm:$0xff] %v666_v41 }
 0x1c3   : > { %v603_v42 = vpop.f32.mrf.mxu2 }
 0x1c4   : > { %v668_v43 = vpop.f32.mrf.mxu3  ;;  %v604_v44 = vadd.f32 %v1342_v53, %v603_v42 }
 0x1c6   : > { %v669_v45 = vadd.f32 %v668_v43, %v604_v44 }
 0x1c8   : > { %690 = vst [vmem:[%s1347_s28 + $0x68] sm:$0xff] %v669_v45 }
 0x1cb   : > { %v606_v46 = vpop.f32.mrf.mxu2 }
 0x1cc   : > { %v671_v47 = vpop.f32.mrf.mxu3  ;;  %v607_v48 = vadd.f32 %v1342_v53, %v606_v46 }
 0x1ce   : > { %v672_v49 = vadd.f32 %v671_v47, %v607_v48 }
 0x1d0   : > { %691 = vst [vmem:[%s1347_s28 + $0x70] sm:$0xff] %v672_v49 }
 0x1d3   : > { %v609_v50 = vpop.f32.mrf.mxu2 }
 0x1d4   : > { %v674_v51 = vpop.f32.mrf.mxu3  ;;  %v610_v52 = vadd.f32 %v1342_v53, %v609_v50 }
 0x1d6   : > { %v675_v54 = vadd.f32 %v674_v51, %v610_v52 }
 0x1d8   : > { %692 = vst [vmem:[%s1347_s28 + $0x78] sm:$0xff] %v675_v54 }
 0x1d9   : > { %1064 = shalt.err (!%p1061_p10)
}
 0x1da   : > { %s1120_s17 = smov 128   ;;  %s1121_s29 = smov 8  }
 0x1db   : > { %847 = dma.vmem_to_hbm [thread:$0]  (%p1237_p3), %s707_s13, 2048, %s709_s12, %s694_s14, %s1120_s17, %s1120_s17, %s1121_s29  }
 0x1dc PF: > { %s723_s28 = sand.u32 1, %s1099_s18   ;;  %p1428_p12 = scmp.ge.s32.totalorder %s1111_s21, 2 }
 0x1dd   : > { %s724_s16 = scalar_lea.sflag [#allocation4], %s723_s28 }
 0x1de   : > { %p864_p13 = pnand %p1428_p12, %p1187_p6 }
 0x1e0   : > { %p865_p0 = pneg %p864_p13 }
 0x1e2   : > { %1094 = dma.done.wait (%p865_p0), %s724_s16, 2048  }
 0x1e3   : > { %1096 = vsyncadd (%p865_p0), %s724_s16, 4294965248  ;;  %p20_p5 = scmp.ge.s32.totalorder %s1224_s30, 4   ;;  %s1429_s18 = smov %s1103_s19 }
 0x1e4   : > { %s1430_s19 = smov %s1107_s20  ;;  %s1431_s20 = smov %s1233_s9 }
 0x1e5   : > { %s1432_s21 = smov %s1224_s30  ;;  %22 = sbr.rel (!%p20_p5) target bundleno = 7 (0x7), region = 97 }
 0x1ea   :  { %730 = vsyncpa [#allocation3], 1 }
 0x1eb   :  { %732 = vsyncpa [#allocation3 + $0x1], 1 }
 0x1ec   :  { %733 = vsyncpa [#allocation6], 1 }
 0x1ed   :  { %734 = vsyncpa [#allocation9], 1 }
 0x1ee   :  { %735 = vsyncpa [#allocation4], 1 }
 0x1ef   :  { %737 = vsyncpa [#allocation4 + $0x1], 1 }

</bundles_post_ra>
